<compile_context>
chip_gen: v7x
topology: tpu7x:2x2x1
jax: 0.10.0
libtpu: 0.0.40
codegen_flags: <defaults>
</compile_context>

<pallas_src>
import functools
import math

import jax
import jax.numpy as jnp
from jax import lax
from jax.experimental import pallas as pl
from jax.experimental.pallas import tpu as pltpu


def _round_up(n: int, m: int) -> int:
    return ((n + m - 1) // m) * m


def _pick_spatial_chunk(hw_pad, rows, bytes_per_elem, target_bytes=4 * 1024 * 1024):
    """Largest multiple-of-128 divisor of hw_pad whose (rows, chunk) block fits."""
    n = hw_pad // 128
    best = 128
    for d in range(1, n + 1):
        if n % d == 0 and rows * (d * 128) * bytes_per_elem <= target_bytes:
            best = d * 128
    return best


# ----------------------------- Pallas kernels -------------------------------


def backbone_kernel(x_ref, wfull_ref, sel_ref, bias_ref, fn_ref, acc_ref):
    """Synthetic backbone: GAP over spatial + linear projection + L2-normalize.

    Grid: (spatial_chunks,) — reduction axis ("arbitrary"). All other inputs
    and the output stay resident in VMEM across the whole grid.

    x_ref:     (BC, THW) f32   dense (batch*channel, spatial) image chunk
    wfull_ref: (BC, F)   f32   projection weight replicated per (b, c) row
    sel_ref:   (B, BC)   f32   row-group matrix (1/HW on the rows of batch b)
    bias_ref:  (1, F)    f32   projection bias
    fn_ref:    (B, F)    f32   L2-normalized features (output)
    acc_ref:   (BC, 1)   f32   running per-row spatial sum (scratch)
    """
    s = pl.program_id(0)

    @pl.when(s == 0)
    def _():
        acc_ref[...] = jnp.zeros_like(acc_ref)

    # Lane-axis reduction of the dense (BC, THW) chunk; f32 in, f32 accum.
    acc_ref[...] += jnp.sum(x_ref[...], axis=-1, keepdims=True)

    @pl.when(s == pl.num_programs(0) - 1)
    def _():
        # feat[b, f] = (1/HW) * sum_c acc[b*C + c] * w[c, f] + bias[f]
        # The (B*C,) -> (B, C) regroup is expressed as a tiny row-grouping
        # matmul (1/HW folded into sel), so no in-kernel reshape is needed.
        contrib = acc_ref[...] * wfull_ref[...]                       # (BC, F)
        feat = jnp.dot(sel_ref[...], contrib,
                       preferred_element_type=jnp.float32) + bias_ref[...]
        # F.normalize(x, dim=1), eps=1e-12 — rsqrt runs on the EUP.
        sumsq = jnp.sum(feat * feat, axis=-1, keepdims=True)
        fn_ref[...] = feat * lax.rsqrt(jnp.maximum(sumsq, 1e-24))


def arc_margin_kernel(fn_ref, wt_ref, label_ref, out_ref, *, scale, cos_m,
                      sin_m, th, mm, easy_margin, tile_nc):
    """ArcMarginProduct forward on one class tile. Grid: (class_tiles,), parallel.

    fn_ref:    (B, F)    f32   L2-normalized features (resident)
    wt_ref:    (F, TNC)  bf16  pre-transposed class-weight tile (streamed)
    label_ref: (B, 1)    i32   class labels (resident)
    out_ref:   (B, TNC)  f32   scaled logits for this class tile
    """
    w_bf = wt_ref[...]
    w32 = w_bf.astype(jnp.float32)
    # Per-class inverse norm applied as a post-matmul column scale; the
    # normalized weight tile is never materialized (rsqrt -> EUP).
    inv_wn = lax.rsqrt(jnp.maximum(jnp.sum(w32 * w32, axis=0, keepdims=True),
                                   1e-24))                            # (1, TNC)

    # Canonical (B, F) @ (F, TNC) bf16 MXU matmul with f32 accumulation; the
    # weights were pre-transposed in HBM so no per-tile transpose is emitted.
    cosine = jnp.dot(fn_ref[...].astype(jnp.bfloat16), w_bf,
                     preferred_element_type=jnp.float32) * inv_wn

    # Clamp to avoid NaN from fp rounding when |cosine| slightly exceeds 1.
    sine = jnp.sqrt(jnp.maximum(1.0 - cosine * cosine, 0.0))
    phi = cosine * cos_m - sine * sin_m
    if easy_margin:
        phi = jnp.where(cosine > 0.0, phi, cosine)
    else:
        phi = jnp.where(cosine > th, phi, cosine - mm)

    j = pl.program_id(0)
    class_idx = lax.broadcasted_iota(jnp.int32, cosine.shape, 1) + j * tile_nc
    out_ref[...] = jnp.where(class_idx == label_ref[...], phi, cosine) * scale


# ----------------------------- Python wrappers -------------------------------


def prepare_params(params, image_shape, *, tnc_max=2048):
    """One-time parameter prep (pads / casts / transposes hoisted out of forward)."""
    B, C, H, W = image_shape
    F_dim = params["bb_w"].shape[1]
    NC = params["arc_w"].shape[0]
    HW = H * W
    BC = B * C
    B_pad = _round_up(B, 8)
    BC_pad = _round_up(BC, 8)

    # Row-group ("un-reshape") matrix: sel[b, bc] = 1/HW if bc // C == b.
    b_idx = jnp.arange(B_pad)[:, None]
    bc_idx = jnp.arange(BC_pad)[None, :]
    sel = jnp.where((bc_idx // C == b_idx) & (bc_idx < BC) & (b_idx < B),
                    1.0 / HW, 0.0).astype(jnp.float32)

    # Projection weight replicated per (batch, channel) row: wfull[bc] = bb_w[bc % C].
    c_of = jnp.arange(BC_pad) % C
    wfull = params["bb_w"].astype(jnp.float32)[c_of]
    wfull = jnp.where((jnp.arange(BC_pad) < BC)[:, None], wfull, 0.0)

    bias = params["bb_b"].astype(jnp.float32).reshape(1, F_dim)

    # ArcMargin weight: bf16 (halves the dominant HBM stream), transposed once
    # to (F, NC) for the canonical matmul form, class axis padded to the tile.
    tnc = min(tnc_max, _round_up(NC, 128))
    nc_pad = _round_up(NC, tnc)
    arc_w_t = jnp.pad(params["arc_w"].astype(jnp.bfloat16).T,
                      ((0, 0), (0, nc_pad - NC)))

    return {
        "sel": sel, "wfull": wfull, "bias": bias, "arc_w_t": arc_w_t,
        "meta": dict(B=B, C=C, H=H, W=W, F=F_dim, NC=NC, HW=HW, BC=BC,
                     B_pad=B_pad, BC_pad=BC_pad, TNC=tnc, NC_pad=nc_pad),
    }


def shopee_forward(image, label, prep, *, scale=30.0, margin=0.5,
                   easy_margin=False):
    """Full Shopee_Model.forward(image, label) (extract_feat=False)."""
    m = prep["meta"]
    B, C, H, W = image.shape
    assert (B, C, H, W) == (m["B"], m["C"], m["H"], m["W"])
    F_dim, NC = m["F"], m["NC"]
    HW, BC = m["HW"], m["BC"]
    B_pad, BC_pad = m["B_pad"], m["BC_pad"]
    TNC, NC_pad = m["TNC"], m["NC_pad"]

    # Dense 2-D (batch*channel, spatial) view of the NCHW image: sublane axis
    # fully dense, long spatial axis on lanes. Free reshape, no dtype cast —
    # the f32 image is DMA'd directly (single pass over it).
    x2d = image.reshape(BC, HW)
    HW_pad = _round_up(HW, 128)
    if BC_pad != BC or HW_pad != HW:
        # Rare fallback; zero-pad is neutral (1/HW uses the true HW and sel
        # ignores padded rows).
        x2d = jnp.pad(x2d, ((0, BC_pad - BC), (0, HW_pad - HW)))

    # Big spatial chunks (one block when it fits a few MB) so per-grid-step
    # overhead is negligible and DMAs run near the HBM roofline.
    thw = _pick_spatial_chunk(HW_pad, BC_pad, 4)
    n_chunks = HW_pad // thw

    # Tile budgets (<=4 MB blocks, <=2 MB bf16 weight tiles) fit comfortably
    # inside v7x's 64 MiB VMEM with double-buffering headroom.
    vmem_limit = 32 * 1024 * 1024

    # --- backbone: GAP + linear + feature L2-normalization ---
    f_n = pl.pallas_call(
        backbone_kernel,
        out_shape=jax.ShapeDtypeStruct((B_pad, F_dim), jnp.float32),
        grid_spec=pltpu.PrefetchScalarGridSpec(
            num_scalar_prefetch=0,
            grid=(n_chunks,),
            in_specs=[
                pl.BlockSpec((BC_pad, thw), lambda s: (0, s)),
                pl.BlockSpec((BC_pad, F_dim), lambda s: (0, 0)),
                pl.BlockSpec((B_pad, BC_pad), lambda s: (0, 0)),
                pl.BlockSpec((1, F_dim), lambda s: (0, 0)),
            ],
            out_specs=pl.BlockSpec((B_pad, F_dim), lambda s: (0, 0)),
            scratch_shapes=[pltpu.VMEM((BC_pad, 1), jnp.float32)],
        ),
        compiler_params=pltpu.CompilerParams(
            dimension_semantics=("arbitrary",),
            vmem_limit_bytes=vmem_limit,
        ),
    )(x2d, prep["wfull"], prep["sel"], prep["bias"])

    label2d = jnp.pad(label.astype(jnp.int32), (0, B_pad - B)).reshape(B_pad, 1)

    cos_m = math.cos(margin)
    sin_m = math.sin(margin)
    th = math.cos(math.pi - margin)
    mm = math.sin(math.pi - margin) * margin

    # --- ArcMarginProduct, tiled over classes (lane-dense output tiles) ---
    out = pl.pallas_call(
        functools.partial(arc_margin_kernel, scale=float(scale), cos_m=cos_m,
                          sin_m=sin_m, th=th, mm=mm, easy_margin=easy_margin,
                          tile_nc=TNC),
        out_shape=jax.ShapeDtypeStruct((B_pad, NC_pad), jnp.float32),
        grid_spec=pltpu.PrefetchScalarGridSpec(
            num_scalar_prefetch=0,
            grid=(NC_pad // TNC,),
            in_specs=[
                pl.BlockSpec((B_pad, F_dim), lambda j: (0, 0)),
                pl.BlockSpec((F_dim, TNC), lambda j: (0, j)),
                pl.BlockSpec((B_pad, 1), lambda j: (0, 0)),
            ],
            out_specs=pl.BlockSpec((B_pad, TNC), lambda j: (0, j)),
        ),
        compiler_params=pltpu.CompilerParams(
            dimension_semantics=("parallel",),
            vmem_limit_bytes=vmem_limit,
        ),
    )(f_n, prep["arc_w_t"], label2d)

    return out[:B, :NC]


def init_params(key, in_channels, feat_dim, num_class):
    k1, k2, k3 = jax.random.split(key, 3)
    # synthetic backbone projection
    bb_w = jax.random.normal(k1, (in_channels, feat_dim), jnp.float32) * 0.1
    bb_b = jax.random.normal(k2, (1, feat_dim), jnp.float32) * 0.01
    # ArcMargin weight: nn.init.xavier_uniform_ on (num_class, feat_dim)
    bound = math.sqrt(6.0 / (num_class + feat_dim))
    arc_w = jax.random.uniform(k3, (num_class, feat_dim), jnp.float32,
                               minval=-bound, maxval=bound)
    return {"bb_w": bb_w, "bb_b": bb_b, "arc_w": arc_w}


def _reference_forward(image, label, params, *, scale=30.0, margin=0.5,
                       easy_margin=False):
    """Plain-JAX reference.

    Uses the same parameter storage precision as the kernel path (bf16 class
    weights, bf16 features at the MXU boundary); all math in f32 at HIGHEST
    matmul precision.
    """
    hp = jax.lax.Precision.HIGHEST
    B, C, H, W = image.shape
    pooled = jnp.mean(image.reshape(B, C, H * W), axis=-1)
    feat = jnp.dot(pooled, params["bb_w"], precision=hp) + params["bb_b"]
    f_n = feat / jnp.maximum(
        jnp.linalg.norm(feat, axis=-1, keepdims=True), 1e-12)
    w = params["arc_w"].astype(jnp.bfloat16).astype(jnp.float32)  # kernel streams bf16
    w_n = w / jnp.maximum(jnp.linalg.norm(w, axis=-1, keepdims=True), 1e-12)
    cosine = jnp.dot(f_n.astype(jnp.bfloat16).astype(jnp.float32), w_n.T,
                     precision=hp)
    sine = jnp.sqrt(jnp.maximum(1.0 - cosine ** 2, 0.0))
    cos_m, sin_m = math.cos(margin), math.sin(margin)
    th = math.cos(math.pi - margin)
    mm = math.sin(math.pi - margin) * margin
    phi = cosine * cos_m - sine * sin_m
    if easy_margin:
        phi = jnp.where(cosine > 0.0, phi, cosine)
    else:
        phi = jnp.where(cosine > th, phi, cosine - mm)
    one_hot = jax.nn.one_hot(label, w.shape[0], dtype=jnp.float32)
    return (one_hot * phi + (1.0 - one_hot) * cosine) * scale


if __name__ == "__main__":
    # Small shapes consistent with the forward:
    #   image: (B=2, C=4, H=16, W=16) NCHW, label: (B,) int32
    #   backbone feature dim F=32, num_class=16
    B, C, H, W = 2, 4, 16, 16
    F_dim, NC = 32, 16

    key = jax.random.PRNGKey(0)
    k_img, k_lbl, k_par = jax.random.split(key, 3)

    image = jax.random.normal(k_img, (B, C, H, W), jnp.float32)
    label = jax.random.randint(k_lbl, (B,), 0, NC, jnp.int32)
    params = init_params(k_par, C, F_dim, NC)

    # One-time pad / cast / transpose of parameters (hoisted out of forward).
    prep = prepare_params(params, image.shape)

    out = shopee_forward(image, label, prep)
    out = jax.block_until_ready(out)

    ref = _reference_forward(image, label, params)
    assert out.shape == (B, NC)
    # Tolerance accounts for bf16 weight/feature streaming on the MXU.
    assert jnp.allclose(out, ref, atol=5e-2, rtol=5e-3), "mismatch vs reference"

    print("KERNEL_OK")
</pallas_src>

<mosaic_0001>
module attributes {stable_mosaic.version = 11 : i64} {
  func.func @backbone_kernel(%arg0: i32, %arg1: memref<8x256xf32, #tpu.memory_space<vmem>>, %arg2: memref<8x32xf32, #tpu.memory_space<vmem>>, %arg3: memref<8x8xf32, #tpu.memory_space<vmem>>, %arg4: memref<1x32xf32, #tpu.memory_space<vmem>>, %arg5: memref<8x32xf32, #tpu.memory_space<vmem>>, %arg6: memref<8x1xf32, #tpu.memory_space<vmem>>) attributes {dimension_semantics = [#tpu.dimension_semantics<arbitrary>], iteration_bounds = array<i64: 1>, scalar_prefetch = 0 : i64, scratch_operands = 1 : i64, tpu.core_type = #tpu.core_type<tc>, window_params = [{transform_indices = @transform_0, window_bounds = array<i64: 8, 256>}, {pipeline_mode = #tpu.pipeline_mode<synchronous>, transform_indices = @transform_1, window_bounds = array<i64: 8, 32>}, {pipeline_mode = #tpu.pipeline_mode<synchronous>, transform_indices = @transform_2, window_bounds = array<i64: 8, 8>}, {pipeline_mode = #tpu.pipeline_mode<synchronous>, transform_indices = @transform_3, window_bounds = array<i64: 1, 32>}, {pipeline_mode = #tpu.pipeline_mode<synchronous>, transform_indices = @transform_4, window_bounds = array<i64: 8, 32>}]} {
    %c0_i32 = arith.constant 0 : i32
    %0 = arith.cmpi eq, %arg0, %c0_i32 : i32
    %1 = arith.extui %0 : i1 to i32
    %c0_i32_0 = arith.constant 0 : i32
    %2 = arith.cmpi ne, %1, %c0_i32_0 : i32
    scf.if %2 {
      %cst_8 = arith.constant 0.000000e+00 : f32
      %12 = vector.broadcast %cst_8 : f32 to vector<8x1xf32>
      %c0_9 = arith.constant 0 : index
      %c0_10 = arith.constant 0 : index
      %13 = vector.load %arg6[%c0_9, %c0_10] : memref<8x1xf32, #tpu.memory_space<vmem>>, vector<8x1xf32>
      tpu.vector_store %arg6[%c0_9, %c0_10], %12 {strides = array<i32>} : memref<8x1xf32, #tpu.memory_space<vmem>>, vector<8x1xf32>,
    } else {
    }
    %c0 = arith.constant 0 : index
    %c0_1 = arith.constant 0 : index
    %3 = vector.load %arg6[%c0, %c0_1] : memref<8x1xf32, #tpu.memory_space<vmem>>, vector<8x1xf32>
    %c0_2 = arith.constant 0 : index
    %c0_3 = arith.constant 0 : index
    %4 = vector.load %arg1[%c0_2, %c0_3] : memref<8x256xf32, #tpu.memory_space<vmem>>, vector<8x256xf32>
    %cst = arith.constant dense<0.000000e+00> : vector<8xf32>
    %5 = vector.multi_reduction <add>, %4, %cst [1] : vector<8x256xf32> to vector<8xf32>
    %6 = vector.shape_cast %5 : vector<8xf32> to vector<8x1xf32>
    %7 = arith.addf %3, %6 : vector<8x1xf32>
    %c0_4 = arith.constant 0 : index
    %c0_5 = arith.constant 0 : index
    %8 = vector.load %arg6[%c0_4, %c0_5] : memref<8x1xf32, #tpu.memory_space<vmem>>, vector<8x1xf32>
    tpu.vector_store %arg6[%c0_4, %c0_5], %7 {strides = array<i32>} : memref<8x1xf32, #tpu.memory_space<vmem>>, vector<8x1xf32>,
    %c0_i32_6 = arith.constant 0 : i32
    %9 = arith.cmpi eq, %arg0, %c0_i32_6 : i32
    %10 = arith.extui %9 : i1 to i32
    %c0_i32_7 = arith.constant 0 : i32
    %11 = arith.cmpi ne, %10, %c0_i32_7 : i32
    scf.if %11 {
      %c0_8 = arith.constant 0 : index
      %c0_9 = arith.constant 0 : index
      %12 = vector.load %arg6[%c0_8, %c0_9] : memref<8x1xf32, #tpu.memory_space<vmem>>, vector<8x1xf32>
      %c0_10 = arith.constant 0 : index
      %c0_11 = arith.constant 0 : index
      %13 = vector.load %arg2[%c0_10, %c0_11] : memref<8x32xf32, #tpu.memory_space<vmem>>, vector<8x32xf32>
      %14 = vector.broadcast %12 : vector<8x1xf32> to vector<8x32xf32>
      %15 = arith.mulf %14, %13 : vector<8x32xf32>
      %c0_12 = arith.constant 0 : index
      %c0_13 = arith.constant 0 : index
      %16 = vector.load %arg3[%c0_12, %c0_13] : memref<8x8xf32, #tpu.memory_space<vmem>>, vector<8x8xf32>
      %cst_14 = arith.constant dense<0.000000e+00> : vector<8x32xf32>
      %17 = tpu.matmul %16, %15, %cst_14 {dimension_numbers = #tpu.dot_dimension_numbers<[1], [0], [0], [1], [0, 0, 1, 1], [], []>} : vector<8x8xf32>, vector<8x32xf32>, vector<8x32xf32> -> vector<8x32xf32>
      %c0_15 = arith.constant 0 : index
      %c0_16 = arith.constant 0 : index
      %18 = vector.load %arg4[%c0_15, %c0_16] : memref<1x32xf32, #tpu.memory_space<vmem>>, vector<1x32xf32>
      %19 = vector.broadcast %18 : vector<1x32xf32> to vector<8x32xf32>
      %20 = arith.addf %17, %19 : vector<8x32xf32>
      %21 = arith.mulf %20, %20 : vector<8x32xf32>
      %cst_17 = arith.constant dense<0.000000e+00> : vector<8xf32>
      %22 = vector.multi_reduction <add>, %21, %cst_17 [1] : vector<8x32xf32> to vector<8xf32>
      %23 = vector.shape_cast %22 : vector<8xf32> to vector<8x1xf32>
      %cst_18 = arith.constant 1.000000e-24 : f32
      %24 = vector.broadcast %cst_18 : f32 to vector<8x1xf32>
      %25 = arith.maximumf %23, %24 : vector<8x1xf32>
      %26 = math.rsqrt %25 : vector<8x1xf32>
      %27 = vector.broadcast %26 : vector<8x1xf32> to vector<8x32xf32>
      %28 = arith.mulf %20, %27 : vector<8x32xf32>
      %c0_19 = arith.constant 0 : index
      %c0_20 = arith.constant 0 : index
      %29 = vector.load %arg5[%c0_19, %c0_20] : memref<8x32xf32, #tpu.memory_space<vmem>>, vector<8x32xf32>
      tpu.vector_store %arg5[%c0_19, %c0_20], %28 {strides = array<i32>} : memref<8x32xf32, #tpu.memory_space<vmem>>, vector<8x32xf32>,
    } else {
    }
    return
  }
  func.func @transform_0(%arg0: i32) -> (i32, i32) {
    %c0_i32 = arith.constant 0 : i32
    %c0_i32_0 = arith.constant 0 : i32
    return %c0_i32, %arg0 : i32, i32
  }
  func.func @transform_1(%arg0: i32) -> (i32, i32) {
    %c0_i32 = arith.constant 0 : i32
    %c0_i32_0 = arith.constant 0 : i32
    %c0_i32_1 = arith.constant 0 : i32
    return %c0_i32, %c0_i32_0 : i32, i32
  }
  func.func @transform_2(%arg0: i32) -> (i32, i32) {
    %c0_i32 = arith.constant 0 : i32
    %c0_i32_0 = arith.constant 0 : i32
    %c0_i32_1 = arith.constant 0 : i32
    return %c0_i32, %c0_i32_0 : i32, i32
  }
  func.func @transform_3(%arg0: i32) -> (i32, i32) {
    %c0_i32 = arith.constant 0 : i32
    %c0_i32_0 = arith.constant 0 : i32
    %c0_i32_1 = arith.constant 0 : i32
    return %c0_i32, %c0_i32_0 : i32, i32
  }
  func.func @transform_4(%arg0: i32) -> (i32, i32) {
    %c0_i32 = arith.constant 0 : i32
    %c0_i32_0 = arith.constant 0 : i32
    %c0_i32_1 = arith.constant 0 : i32
    return %c0_i32, %c0_i32_0 : i32, i32
  }
}

</mosaic_0001>

<bundles_post_ra>
// kernel: tpu_custom_call.1
= control target key start
LH: loop header
LB: loop body
LE: loop exit
PB: predicated region body
PF: predicated region fallthrough
CT: control target
= control target key end

     0   :  { %9 = vsyncpa [#allocation4], 0  ;;  %s382_s0 = inlined_call_operand.hbm [shape: f32[8,256], index: 0, kind: input, shape index: {}]   ;;  %s383_s1 = inlined_call_operand.hbm [shape: f32[8,32], index: 1, kind: input, shape index: {}]   ;;  %s384_s2 = inlined_call_operand.hbm [shape: f32[8,8], index: 2, kind: input, shape index: {}]   ;;  %s385_s3 = inlined_call_operand.vmem [shape: f32[1,32], index: 3, kind: input, shape index: {}]   ;;  %s386_s4 = inlined_call_operand.hbm [shape: f32[8,32], index: 4, kind: output, shape index: {}]  }
   0x1   :  { %10 = vsyncpa [#allocation7], 0 }
   0x2   :  { %11 = vsyncpa [#allocation5], 0  ;;  %s299_s15 = smov [#allocation6]   ;;  %s300_s17 = smov [#allocation3]  }
   0x3   :  { %s28_s16 = sshll.u32 %s299_s15, 4  ;;  %s18_s18 = sshll.u32 %s300_s17, 4  ;;  %s29_s16 = int_to_ptr.vmem [resolvable:$true] %s28_s16  ;;  %s19_s18 = int_to_ptr.vmem [resolvable:$true] %s18_s18 }
   0x4   :  { %s205_s21 = scalar_lea.hbm %s383_s1, 128 }
   0x5   :  { %p206_p0 = scmp.ne.s32.totalorder %s383_s1, %s205_s21  ;;  %p209_p1 = scmp.lt.u32.totalorder %s205_s21, %s383_s1 }
   0x7   :  { %p211_p2 = pnand %p209_p1, %p206_p0 }
   0x9   :  { %214 = shalt.err (!%p211_p2)
}
   0xa   :  { %s215_s26 = scalar_lea.vmem %s29_s16, 128  ;;  %p220_p4 = scmp.lt.s32.totalorder %s29_s16, %s29_s16 }
   0xb   :  { %p216_p3 = scmp.ne.s32.totalorder %s29_s16, %s215_s26  ;;  %p221_p5 = scmp.lt.s32.totalorder %s215_s26, %s215_s26 }
   0xd   :  { %p222_p6 = por %p221_p5, %p220_p4 }
   0xf   :  { %p223_p7 = pnand %p222_p6, %p216_p3 }
  0x11   :  { %226 = shalt.err (!%p223_p7)
}
  0x12   :  { %31 = dma.hbm_to_vmem [thread:$0]  %s383_s1, 128, %s29_s16, [#allocation7]  }
  0x13   :  { %s227_s5 = scalar_lea.hbm %s382_s0, 256 }
  0x14   :  { %p228_p8 = scmp.ne.s32.totalorder %s382_s0, %s227_s5  ;;  %p231_p9 = scmp.lt.u32.totalorder %s227_s5, %s382_s0 }
  0x16   :  { %p233_p10 = pnand %p231_p9, %p228_p8 }
  0x18   :  { %236 = shalt.err (!%p233_p10)
}
  0x19   :  { %s237_s10 = scalar_lea.vmem %s19_s18, 256  ;;  %p242_p12 = scmp.lt.s32.totalorder %s19_s18, %s19_s18 }
  0x1a   :  { %p238_p11 = scmp.ne.s32.totalorder %s19_s18, %s237_s10  ;;  %p243_p13 = scmp.lt.s32.totalorder %s237_s10, %s237_s10 }
  0x1c   :  { %p244_p0 = por %p243_p13, %p242_p12 }
  0x1e   :  { %p245_p1 = pnand %p244_p0, %p238_p11 }
  0x20   :  { %248 = shalt.err (!%p245_p1)
}
  0x21   :  { %21 = dma.hbm_to_vmem [thread:$0]  %s382_s0, 256, %s19_s18, [#allocation4]  }
  0x22   :  { %s301_s12 = smov [#allocation8]   ;;  %s249_s16 = scalar_lea.hbm %s384_s2, 128 }
  0x23   :  { %s38_s13 = sshll.u32 %s301_s12, 4  ;;  %p250_p2 = scmp.ne.s32.totalorder %s384_s2, %s249_s16  ;;  %s39_s13 = int_to_ptr.vmem [resolvable:$true] %s38_s13 }
  0x24   :  { %p253_p3 = scmp.lt.u32.totalorder %s249_s16, %s384_s2 }
  0x26   :  { %p255_p4 = pnand %p253_p3, %p250_p2 }
  0x28   :  { %258 = shalt.err (!%p255_p4)
}
  0x29   :  { %s259_s22 = scalar_lea.vmem %s39_s13, 128  ;;  %p264_p6 = scmp.lt.s32.totalorder %s39_s13, %s39_s13 }
  0x2a   :  { %p260_p5 = scmp.ne.s32.totalorder %s39_s13, %s259_s22  ;;  %p265_p7 = scmp.lt.s32.totalorder %s259_s22, %s259_s22 }
  0x2c   :  { %p266_p8 = por %p265_p7, %p264_p6 }
  0x2e   :  { %p267_p9 = pnand %p266_p8, %p260_p5 }
  0x30   :  { %270 = shalt.err (!%p267_p9)
}
  0x31   :  { %41 = dma.hbm_to_vmem [thread:$0]  %s384_s2, 128, %s39_s13, [#allocation7]  }
  0x32   :  { %293 = dma.done.wait [#allocation4], 256  }
  0x33   :  { %294 = vsyncadd [#allocation4], 4294967040 }
  0x34   :  { %295 = dma.done.wait [#allocation7], 256  }
  0x35   :  { %296 = vsyncadd [#allocation7], 4294967040  ;;  %vm57_vm0 = vcmask 7168   ;;  %v302_v0 = vmov 0.0   ;;  %v60_v1 = vld [vmem:[#allocation3] sm:$0xff]  ;;  %v61_v2 = vld [vmem:[#allocation3 + $0x8] sm:$0xff] }
  0x36   :  { %58 = vst.msk [vmem:[#allocation2] sm:$0xff] %vm57_vm0, %v302_v0  ;;  %190 = vmatprep.subr.mxu0 %v302_v0  ;;  %v62_v3 = vadd.f32 %v61_v2, %v60_v1  ;;  %v303_v4 = vmov 0   ;;  %vm304_vm1 = vmmov 0   ;;  %v72_v9 = vld [vmem:[#allocation6] sm:$0xff]  ;;  %v79_v12 = vld [vmem:[#allocation8] sm:$0xff]  ;;  %vm87_vm2 = vcmask 64512  }
  0x37   :  { %202 = vset.pattern.permute.xlu0 %v303_v4  ;;  %192 = vmatprep.mubr.msk.f32.mxu0 %vm304_vm1, %v302_v0  ;;  %v186_v13 = vld [vmem:[%s385_s3] ss:$0 sm:$0xff]  ;;  %vm162_vm3 = vcmask 261120   ;;  %s305_s24 = smov [#allocation9]  }
  0x38   :  { %63 = vadd.xlane.f32.xlu0 %v62_v3  ;;  %s176_s25 = sshll.u32 %s305_s24, 4  ;;  %s177_s25 = int_to_ptr.vmem [resolvable:$true] %s176_s25 }
  0x39   :  { %s271_s26 = scalar_lea.vmem %s177_s25, 128  ;;  %p276_p11 = scmp.lt.s32.totalorder %s177_s25, %s177_s25 }
  0x3a   :  { %p272_p10 = scmp.ne.s32.totalorder %s177_s25, %s271_s26  ;;  %p277_p12 = scmp.lt.s32.totalorder %s271_s26, %s271_s26 }
  0x3c   :  { %p278_p13 = por %p277_p12, %p276_p11 }
  0x3d   :  { %v59_v5 = vld [vmem:[#allocation2] sm:$0xff] }
  0x3e   :  { %p279_p0 = pnand %p278_p13, %p272_p10 }
  0xc5   :  { %v64_v6 = vpop.xlane.xlu0 %63 }
  0xc6   :  { %v65_v7 = vadd.f32 %v64_v6, %v59_v5 }
  0xc8   :  { %67 = vst.msk [vmem:[#allocation2] sm:$0xff] %vm57_vm0, %v65_v7 }
  0xcf   :  { %v71_v8 = vld [vmem:[#allocation2] sm:$0xff] }
  0xd0   :  { %75 = vperm.xlu0 %202, %v71_v8  }
 0x14f   :  { %v76_v10 = vpop.permute.xlu0 %75 }
 0x150   :  { %v78_v11 = vmul.f32 %v76_v10, %v72_v9 }
 0x152   :  { %191 = vmatpush3.msra.mxu0 %v78_v11 }
 0x153   :  { %193 = vmatmul.mubr.msk.f32.vlgmr.msra.gmra.mrb[0].mxu0 %vm87_vm2, %v79_v12 }
 0x226   :  { %v157_v14 = vpop.f32.mrb[0].mxu0 }
 0x227   :  { %v158_v15 = vadd.f32 %v186_v13, %v157_v14  ;;  %v194_v16 = vpop.f32.mrb[1].mxu0 }
 0x229   :  { %v161_v17 = vmul.f32 %v158_v15, %v158_v15 }
 0x22b   :  { %v163_v18 = vsel %vm162_vm3, %v161_v17, 0.0 }
 0x22c   :  { %164 = vadd.xlane.f32.xlu1 %v163_v18 }
 0x2b9   :  { %v165_v19 = vpop.xlane.xlu1 %164 }
 0x2ba   :  { %v166_v20 = vmax.f32 %v165_v19, 1e-24 }
 0x2bc   :  { %203 = vrsqrt.f32 %v166_v20 }
 0x2c6   :  { %v204_v21 = vpop.eup %203 }
 0x2c7   :  { %v168_v22 = vmul.f32 %v204_v21, %v158_v15 }
 0x2c9   :  { %169 = vst.msk [vmem:[#allocation9] sm:$0xff] %vm162_vm3, %v168_v22 }
 0x2ca   :  { %282 = shalt.err (!%p279_p0)
}
 0x2cb   :  { %s283_s28 = scalar_lea.hbm %s386_s4, 128 }
 0x2cc   :  { %p284_p1 = scmp.ne.s32.totalorder %s386_s4, %s283_s28  ;;  %p287_p2 = scmp.lt.u32.totalorder %s283_s28, %s386_s4 }
 0x2ce   :  { %p289_p3 = pnand %p287_p2, %p284_p1 }
 0x2d0   :  { %292 = shalt.err (!%p289_p3)
}
 0x2d1   :  { %179 = dma.vmem_to_hbm [thread:$0]  %s177_s25, 128, %s386_s4, [#allocation5]  }
 0x2d2   :  { %297 = dma.done.wait [#allocation5], 128  }
 0x2d3   :  { %298 = vsyncadd [#allocation5], 4294967168 }
 0x2d4   :  { %183 = vsyncpa [#allocation4], 1 }
 0x2d5   :  { %184 = vsyncpa [#allocation7], 1 }
 0x2d6   :  { %185 = vsyncpa [#allocation5], 1 }

</bundles_post_ra>
